<compile_context>
chip_gen: v6e
topology: v6e:2x2x1
jax: 0.10.0
libtpu: 0.0.40
codegen_flags: <defaults>
</compile_context>

<pallas_src>
import functools

import jax
import jax.numpy as jnp
from jax import lax
from jax.experimental import pallas as pl
from jax.experimental.pallas import tpu as pltpu

_LANE = 128
_SUB = 8


def _round_up(a, b):
    return ((a + b - 1) // b) * b


def _sublane_multiple(dtype):
    # Minimum second-to-last block-dim multiple per dtype packing.
    return {4: 8, 2: 16, 1: 32}.get(jnp.dtype(dtype).itemsize, 8)


def _pick_chunk(brows, cap):
    # Largest streaming-slab row count <= cap that divides the block.
    for c in (64, 32, 16, 8):
        if c <= cap and c <= brows and brows % c == 0:
            return c
    return _SUB


def _bce(x, t):
    # F.binary_cross_entropy clamps both log terms at -100 (PyTorch behavior).
    log_x = jnp.maximum(jnp.log(x), -100.0)
    log_1mx = jnp.maximum(jnp.log(1.0 - x), -100.0)
    return -(t * log_x + (1.0 - t) * log_1mx)


def _pow_gamma(p, gamma):
    # gamma is static. Integer gamma (default 2) -> explicit VPU multiplies
    # instead of exp(gamma*log(p)) on the single EUP.
    g = float(gamma)
    if g.is_integer() and g >= 0:
        e = int(g)
        if e == 0:
            return jnp.ones_like(p)
        result, base = None, p
        while e:
            if e & 1:
                result = base if result is None else result * base
            e >>= 1
            if e:
                base = base * base
        return result
    return p ** gamma


def _tree_fold(v):
    # (chunk, 128) -> (8, 128) pairwise fold (short dependent chain, VPU only).
    while v.shape[0] > _SUB:
        h = v.shape[0] // 2
        v = v[:h, :] + v[h:, :]
    return v


def _chunk_mask(start_row, shape, valid_rows):
    row = start_row + lax.broadcasted_iota(jnp.int32, shape, 0)
    return row < valid_rows


# ---------------- kernels ----------------

def _bce_psum_kernel(x_ref, t_ref, psum_ref, *, block_rows, chunk,
                     valid_rows, need_mask):
    """Per-block partial sums of BCE, streamed chunk-by-chunk (no full-block
    intermediate), folded to one (8,128) tile."""
    base = pl.program_id(0) * block_rows
    local = None
    for r in range(0, block_rows, chunk):
        b = _bce(x_ref[r:r + chunk, :].astype(jnp.float32),
                 t_ref[r:r + chunk, :].astype(jnp.float32))
        if need_mask:
            b = jnp.where(_chunk_mask(base + r, b.shape, valid_rows), b, 0.0)
        local = b if local is None else local + b
    psum_ref[...] = _tree_fold(local)


def _wbce_psum_kernel(x_ref, t_ref, w_ref, wbce_ref, psum_ref, *, block_rows,
                      chunk, valid_rows, need_mask):
    """Weighted BCE per element + per-block partial sums (fallback pass 1),
    streamed chunk-by-chunk: each chunk is stored immediately and added into a
    small in-vreg accumulator (no spill of the full block)."""
    base = pl.program_id(0) * block_rows
    local = None
    for r in range(0, block_rows, chunk):
        wbce = w_ref[r:r + chunk, :].astype(jnp.float32) * _bce(
            x_ref[r:r + chunk, :].astype(jnp.float32),
            t_ref[r:r + chunk, :].astype(jnp.float32))
        if need_mask:
            wbce = jnp.where(_chunk_mask(base + r, wbce.shape, valid_rows),
                             wbce, 0.0)
        wbce_ref[r:r + chunk, :] = wbce
        local = wbce if local is None else local + wbce
    psum_ref[...] = _tree_fold(local)


def _focal_scale_kernel(wbce_ref, mean_ref, out_ref, *, block_rows, chunk,
                        alpha, gamma):
    """loss_i = alpha*(1-exp(-wbce_i))**gamma * mean (fallback pass 2).
    mean arrives as an SMEM scalar; the tile is streamed chunk-by-chunk."""
    mean = mean_ref[0]
    for r in range(0, block_rows, chunk):
        p = 1.0 - jnp.exp(-wbce_ref[r:r + chunk, :])
        out_ref[r:r + chunk, :] = (alpha * _pow_gamma(p, gamma)) * mean


def _focal_weighted_fused_kernel(x_ref, t_ref, w_ref, out_ref, acc_ref, *,
                                 block_rows, chunk, valid_rows, need_mask,
                                 n_total, alpha, gamma, total_rows):
    """Single-pass weighted path: wbce chunks go straight into the VMEM-resident
    output, the sum accumulates in an (8,128) scratch, and the focal scaling is
    applied in place on the last grid step (no wbce HBM round trip).
    NOTE: correctness requires dimension_semantics=('arbitrary',) -- running
    accumulator + last-step epilogue."""
    i = pl.program_id(0)

    @pl.when(i == 0)
    def _():
        acc_ref[...] = jnp.zeros_like(acc_ref)

    base = i * block_rows
    local = None
    for r in range(0, block_rows, chunk):
        wbce = w_ref[r:r + chunk, :].astype(jnp.float32) * _bce(
            x_ref[r:r + chunk, :].astype(jnp.float32),
            t_ref[r:r + chunk, :].astype(jnp.float32))
        if need_mask:
            wbce = jnp.where(_chunk_mask(base + r, wbce.shape, valid_rows),
                             wbce, 0.0)
        start = pl.multiple_of(base + r, chunk)
        out_ref[pl.ds(start, chunk), :] = wbce
        local = wbce if local is None else local + wbce
    acc_ref[...] += _tree_fold(local)

    @pl.when(i == pl.num_programs(0) - 1)
    def _():
        mean = jnp.sum(acc_ref[...]) / n_total   # one XLU reduce per kernel
        trips = total_rows // chunk

        def body(k, carry):
            s = pl.multiple_of(k * chunk, chunk)
            p = 1.0 - jnp.exp(-out_ref[pl.ds(s, chunk), :])
            out_ref[pl.ds(s, chunk), :] = (alpha * _pow_gamma(p, gamma)) * mean
            return carry

        lax.fori_loop(0, trips, body, 0, unroll=min(8, trips))


# ---------------- wrapper ----------------

def _chip_caps():
    """Best-effort (physical VMEM bytes, dual-TensorCore?) for the local chip."""
    vmem = None
    try:
        vmem = int(pltpu.get_tpu_info().vmem_capacity_bytes)
    except Exception:
        vmem = None
    kind = ""
    try:
        kind = jax.devices()[0].device_kind.lower()
    except Exception:
        pass
    dual_core = "v7" in kind
    if vmem is None:
        vmem = (64 << 20) if dual_core else (128 << 20)
    return vmem, dual_core


def focal_loss(inputs, targets, weights=None, alpha=0.8, gamma=2, smooth=1,
               block_rows=1024, fuse_vmem_bytes=None):
    # `smooth` is accepted but unused, matching the PyTorch reference.
    del smooth
    x = inputs.reshape(-1)
    t = targets.reshape(-1)
    w = weights.reshape(-1) if weights is not None else None
    n = x.shape[0]

    # Lane padding only when n % 128 != 0, with BCE-neutral values
    # (x=1, t=1 -> BCE == 0 thanks to the -100 clamp; w=0 -> wBCE == 0).
    rem = n % _LANE
    if rem:
        pad = _LANE - rem
        x = jnp.pad(x, (0, pad), constant_values=1)
        t = jnp.pad(t, (0, pad), constant_values=1)
        if w is not None:
            w = jnp.pad(w, (0, pad), constant_values=0)
    x2 = x.reshape(-1, _LANE)
    t2 = t.reshape(-1, _LANE)
    w2 = w.reshape(-1, _LANE) if w is not None else None
    rows = x2.shape[0]

    operands = (x2, t2) if w2 is None else (x2, t2, w2)
    sub_req = max(_sublane_multiple(a.dtype) for a in operands)  # bf16 -> 16
    brows = _round_up(min(int(block_rows), _round_up(rows, sub_req)), sub_req)
    grid_steps = pl.cdiv(rows, brows)
    padded_rows = grid_steps * brows
    need_mask = padded_rows != rows       # ragged last block -> mask in-kernel
    grid = (grid_steps,)
    chunk = _pick_chunk(brows, 64 if w2 is None else 32)

    tile = pl.BlockSpec((brows, _LANE), lambda i: (i, 0))
    psum_spec = pl.BlockSpec((_SUB, _LANE), lambda i: (i, 0))
    psum_shape = jax.ShapeDtypeStruct((grid_steps * _SUB, _LANE), jnp.float32)

    if w2 is None:
        # Fully parallel grid (both v7x cores), per-block streamed partial sums;
        # tiny tree-reduce + scalar focal formula as wrapper glue.
        psums = pl.pallas_call(
            functools.partial(_bce_psum_kernel, block_rows=brows, chunk=chunk,
                              valid_rows=rows, need_mask=need_mask),
            out_shape=psum_shape,
            grid_spec=pltpu.PrefetchScalarGridSpec(
                num_scalar_prefetch=0, grid=grid,
                in_specs=[tile, tile], out_specs=psum_spec),
            compiler_params=pltpu.CompilerParams(
                dimension_semantics=("parallel",)),
        )(x2, t2)
        mean = jnp.sum(psums) / n
        p = 1.0 - jnp.exp(-mean)
        return alpha * _pow_gamma(p, gamma) * mean

    # ---- weighted paths ----
    vmem_phys, dual_core = _chip_caps()
    if fuse_vmem_bytes is None:
        # v7x: the single-axis 'arbitrary' fused grid runs on one of its two
        # TensorCores, so only use it for small N; larger N takes the fully
        # 'parallel' two-pass path (both cores share the HBM bandwidth).
        # v5e/v6e: single TC -> keep the lower-traffic fused path up to a
        # generous resident-output cap (with an explicit vmem limit below;
        # v5e's scoped default is only 16 MiB).
        fuse_cap = (4 << 20) if dual_core else min(vmem_phys // 4, 32 << 20)
    else:
        fuse_cap = int(fuse_vmem_bytes)

    out_bytes = padded_rows * _LANE * 4
    if out_bytes <= fuse_cap:
        # Fused single pass: 3 reads + 1 write of HBM total.  Explicit VMEM
        # limit = resident output + double-buffered input tiles + headroom,
        # capped below physical VMEM (64 MiB on v7x, 128 MiB on v5e/v6e).
        in_bytes = 2 * sum(brows * _LANE * jnp.dtype(a.dtype).itemsize
                           for a in operands)
        fused_limit = int(min(max(out_bytes + in_bytes + (4 << 20), 16 << 20),
                              vmem_phys - (8 << 20)))
        out = pl.pallas_call(
            functools.partial(_focal_weighted_fused_kernel, block_rows=brows,
                              chunk=chunk, valid_rows=rows,
                              need_mask=need_mask, n_total=float(n),
                              alpha=float(alpha), gamma=gamma,
                              total_rows=padded_rows),
            out_shape=jax.ShapeDtypeStruct((padded_rows, _LANE), jnp.float32),
            grid_spec=pltpu.PrefetchScalarGridSpec(
                num_scalar_prefetch=0, grid=grid,
                in_specs=[tile, tile, tile],
                out_specs=pl.BlockSpec((padded_rows, _LANE), lambda i: (0, 0)),
                scratch_shapes=[pltpu.VMEM((_SUB, _LANE), jnp.float32)]),
            compiler_params=pltpu.CompilerParams(
                dimension_semantics=("arbitrary",),  # required: running accumulator
                vmem_limit_bytes=fused_limit),
        )(x2, t2, w2)
        return out.reshape(-1)[:n]

    # Large-N fallback: two fully parallel passes (wbce round-trips HBM), both
    # streamed chunk-by-chunk so nothing spills past the vreg file.
    out_tile = pl.BlockSpec((brows, _LANE), lambda i: (i, 0))
    wbce, psums = pl.pallas_call(
        functools.partial(_wbce_psum_kernel, block_rows=brows, chunk=chunk,
                          valid_rows=rows, need_mask=need_mask),
        out_shape=(jax.ShapeDtypeStruct((padded_rows, _LANE), jnp.float32),
                   psum_shape),
        grid_spec=pltpu.PrefetchScalarGridSpec(
            num_scalar_prefetch=0, grid=grid,
            in_specs=[tile, tile, tile],
            out_specs=(out_tile, psum_spec)),
        compiler_params=pltpu.CompilerParams(
            dimension_semantics=("parallel",)),
    )(x2, t2, w2)

    mean = (jnp.sum(psums) / n).astype(jnp.float32).reshape(1)

    out = pl.pallas_call(
        functools.partial(_focal_scale_kernel, block_rows=brows, chunk=chunk,
                          alpha=float(alpha), gamma=gamma),
        out_shape=jax.ShapeDtypeStruct((padded_rows, _LANE), jnp.float32),
        grid_spec=pltpu.PrefetchScalarGridSpec(
            num_scalar_prefetch=0, grid=grid,
            in_specs=[out_tile,
                      pl.BlockSpec(memory_space=pltpu.MemorySpace.SMEM)],
            out_specs=out_tile),
        compiler_params=pltpu.CompilerParams(
            dimension_semantics=("parallel",)),
    )(wbce, mean)
    return out.reshape(-1)[:n]


# ---------------- pure-JAX reference ----------------

def _focal_loss_ref(inputs, targets, weights=None, alpha=0.8, gamma=2):
    x = inputs.reshape(-1).astype(jnp.float32)
    t = targets.reshape(-1).astype(jnp.float32)
    bce = _bce(x, t)
    if weights is not None:
        w = weights.reshape(-1).astype(jnp.float32)
        wbce = w * bce
    else:
        wbce = jnp.mean(bce)
    return alpha * (1.0 - jnp.exp(-wbce)) ** gamma * jnp.mean(wbce)


if __name__ == "__main__":
    key = jax.random.PRNGKey(0)

    def make_case(k, shape):
        k1, k2, k3 = jax.random.split(k, 3)
        inputs = jax.nn.sigmoid(jax.random.normal(k1, shape, dtype=jnp.float32))
        targets = (jax.random.uniform(k2, shape) > 0.5).astype(jnp.float32)
        weights = jax.random.uniform(k3, shape, dtype=jnp.float32)
        return inputs, targets, weights

    def check(got, want):
        got = jax.block_until_ready(got)
        assert got.shape == want.shape, (got.shape, want.shape)
        assert jnp.allclose(got, want, rtol=1e-4, atol=1e-5), (got, want)

    k0, k1 = jax.random.split(key)

    # Case 1: NCHW (2, 4, 16, 16) -- lane-aligned, no wrapper padding needed.
    x, t, w = make_case(k0, (2, 4, 16, 16))
    check(focal_loss(x, t), _focal_loss_ref(x, t))                           # scalar path
    check(focal_loss(x, t, w), _focal_loss_ref(x, t, w))                     # fused weighted
    check(focal_loss(x, t, w, fuse_vmem_bytes=0), _focal_loss_ref(x, t, w))  # 2-pass weighted
    check(focal_loss(x, t, w, block_rows=8), _focal_loss_ref(x, t, w))       # multi-step grid

    # Case 2: ragged (3, 5, 7, 11) -- exercises lane pad + in-kernel row masking.
    x, t, w = make_case(k1, (3, 5, 7, 11))
    check(focal_loss(x, t, block_rows=8), _focal_loss_ref(x, t))
    check(focal_loss(x, t, w, block_rows=8), _focal_loss_ref(x, t, w))
    check(focal_loss(x, t, w, block_rows=8, fuse_vmem_bytes=0),
          _focal_loss_ref(x, t, w))

    print("KERNEL_OK")
</pallas_src>

<mosaic_0001>
module attributes {stable_mosaic.version = 11 : i64} {
  func.func @_bce_psum_kernel(%arg0: i32, %arg1: memref<16x128xf32, #tpu.memory_space<vmem>>, %arg2: memref<16x128xf32, #tpu.memory_space<vmem>>, %arg3: memref<8x128xf32, #tpu.memory_space<vmem>>) attributes {dimension_semantics = [#tpu.dimension_semantics<parallel>], iteration_bounds = array<i64: 1>, scalar_prefetch = 0 : i64, scratch_operands = 0 : i64, tpu.core_type = #tpu.core_type<tc>, window_params = [{transform_indices = @transform_0, window_bounds = array<i64: 16, 128>}, {transform_indices = @transform_1, window_bounds = array<i64: 16, 128>}, {transform_indices = @transform_2, window_bounds = array<i64: 8, 128>}]} {
    %c0 = arith.constant 0 : index
    %c0_0 = arith.constant 0 : index
    %0 = vector.load %arg1[%c0, %c0_0] : memref<16x128xf32, #tpu.memory_space<vmem>>, vector<16x128xf32>
    %c0_1 = arith.constant 0 : index
    %c0_2 = arith.constant 0 : index
    %1 = vector.load %arg2[%c0_1, %c0_2] : memref<16x128xf32, #tpu.memory_space<vmem>>, vector<16x128xf32>
    %2 = math.log %0 : vector<16x128xf32>
    %cst = arith.constant -1.000000e+02 : f32
    %3 = vector.broadcast %cst : f32 to vector<16x128xf32>
    %4 = arith.maximumf %2, %3 : vector<16x128xf32>
    %cst_3 = arith.constant 1.000000e+00 : f32
    %5 = vector.broadcast %cst_3 : f32 to vector<16x128xf32>
    %6 = arith.subf %5, %0 : vector<16x128xf32>
    %7 = math.log %6 : vector<16x128xf32>
    %cst_4 = arith.constant -1.000000e+02 : f32
    %8 = vector.broadcast %cst_4 : f32 to vector<16x128xf32>
    %9 = arith.maximumf %7, %8 : vector<16x128xf32>
    %10 = arith.mulf %1, %4 : vector<16x128xf32>
    %cst_5 = arith.constant 1.000000e+00 : f32
    %11 = vector.broadcast %cst_5 : f32 to vector<16x128xf32>
    %12 = arith.subf %11, %1 : vector<16x128xf32>
    %13 = arith.mulf %12, %9 : vector<16x128xf32>
    %14 = arith.addf %10, %13 : vector<16x128xf32>
    %cst_6 = arith.constant 0.000000e+00 : f32
    %15 = vector.broadcast %cst_6 : f32 to vector<16x128xf32>
    %16 = arith.subf %15, %14 : vector<16x128xf32>
    %17 = vector.extract_strided_slice %16 {offsets = [0, 0], sizes = [8, 128], strides = [1, 1]} : vector<16x128xf32> to vector<8x128xf32>
    %18 = vector.extract_strided_slice %16 {offsets = [8, 0], sizes = [8, 128], strides = [1, 1]} : vector<16x128xf32> to vector<8x128xf32>
    %19 = arith.addf %17, %18 : vector<8x128xf32>
    %c0_7 = arith.constant 0 : index
    %c0_8 = arith.constant 0 : index
    %20 = vector.load %arg3[%c0_7, %c0_8] : memref<8x128xf32, #tpu.memory_space<vmem>>, vector<8x128xf32>
    tpu.vector_store %arg3[%c0_7, %c0_8], %19 {strides = array<i32>} : memref<8x128xf32, #tpu.memory_space<vmem>>, vector<8x128xf32>,
    return
  }
  func.func @transform_0(%arg0: i32) -> (i32, i32) {
    %c0_i32 = arith.constant 0 : i32
    %c0_i32_0 = arith.constant 0 : i32
    return %arg0, %c0_i32 : i32, i32
  }
  func.func @transform_1(%arg0: i32) -> (i32, i32) {
    %c0_i32 = arith.constant 0 : i32
    %c0_i32_0 = arith.constant 0 : i32
    return %arg0, %c0_i32 : i32, i32
  }
  func.func @transform_2(%arg0: i32) -> (i32, i32) {
    %c0_i32 = arith.constant 0 : i32
    %c0_i32_0 = arith.constant 0 : i32
    return %arg0, %c0_i32 : i32, i32
  }
}

</mosaic_0001>

<bundles_post_ra>
// kernel: tpu_custom_call.1
= control target key start
LH: loop header
LB: loop body
LE: loop exit
PB: predicated region body
PF: predicated region fallthrough
CT: control target
= control target key end

     0   :  { %7 = vsyncpa [#allocation3], 0  ;;  %s194_s0 = inlined_call_operand.hbm [shape: f32[16,128], index: 0, kind: input, shape index: {}]   ;;  %s195_s1 = inlined_call_operand.hbm [shape: f32[16,128], index: 1, kind: input, shape index: {}]   ;;  %s196_s2 = inlined_call_operand.hbm [shape: f32[8,128], index: 2, kind: output, shape index: {}]  }
   0x1   :  { %8 = vsyncpa [#allocation6], 0 }
   0x2   :  { %9 = vsyncpa [#allocation4], 0  ;;  %s165_s9 = smov [#allocation2]  }
   0x3   :  { %s15_s10 = sshll.u32 %s165_s9, 4  ;;  %s16_s10 = int_to_ptr.vmem [resolvable:$true] %s15_s10 }
   0x4   :  { %s107_s11 = scalar_lea.vmem %s16_s10, 256  ;;  %p112_p1 = scmp.lt.s32.totalorder %s16_s10, %s16_s10 }
   0x5   :  { %p108_p0 = scmp.ne.s32.totalorder %s16_s10, %s107_s11  ;;  %p113_p2 = scmp.lt.s32.totalorder %s107_s11, %s107_s11 }
   0x7   :  { %p114_p3 = por %p113_p2, %p112_p1 }
   0x9   :  { %p115_p4 = pnand %p114_p3, %p108_p0 }
   0xb   :  { %118 = shalt.err (!%p115_p4)
}
   0xc   :  { %s166_s12 = smov 128   ;;  %s167_s13 = smov 8  }
   0xd   :  { %21 = dma.hbm_to_vmem [thread:$0]  %s194_s0, 256, %s16_s10, [#allocation3], %s166_s12, %s166_s12, %s167_s13  }
   0xe   :  { %s168_s16 = smov [#allocation5]  }
   0xf   :  { %s27_s17 = sshll.u32 %s168_s16, 4  ;;  %s28_s17 = int_to_ptr.vmem [resolvable:$true] %s27_s17 }
  0x10   :  { %s127_s18 = scalar_lea.vmem %s28_s17, 256  ;;  %p132_p6 = scmp.lt.s32.totalorder %s28_s17, %s28_s17 }
  0x11   :  { %p128_p5 = scmp.ne.s32.totalorder %s28_s17, %s127_s18  ;;  %p133_p7 = scmp.lt.s32.totalorder %s127_s18, %s127_s18 }
  0x13   :  { %p134_p8 = por %p133_p7, %p132_p6 }
  0x15   :  { %p135_p9 = pnand %p134_p8, %p128_p5 }
  0x17   :  { %138 = shalt.err (!%p135_p9)
}
  0x18   :  { %33 = dma.hbm_to_vmem [thread:$0]  %s195_s1, 256, %s28_s17, [#allocation6], %s166_s12, %s166_s12, %s167_s13  }
  0x19   :  { %159 = dma.done.wait [#allocation3], 256  }
  0x1a   :  { %160 = vsyncadd [#allocation3], 4294967040 }
  0x1b   :  { %161 = dma.done.wait [#allocation6], 256  }
  0x1c   :  { %162 = vsyncadd [#allocation6], 4294967040  ;;  %v40_v0 = vld [vmem:[#allocation2] sm:$0xff]  ;;  %v41_v1 = vld [vmem:[#allocation2 + $0x8] sm:$0xff]  ;;  %s169_s0 = smov [#allocation7]  }
  0x1d   :  { %91 = vlog2.f32 %v40_v0  ;;  %v50_v2 = vsub.f32 1.0, %v40_v0  ;;  %v51_v3 = vsub.f32 1.0, %v41_v1  ;;  %v42_v5 = vld [vmem:[#allocation5] sm:$0xff]  ;;  %v43_v7 = vld [vmem:[#allocation5 + $0x8] sm:$0xff]  ;;  %s76_s1 = sshll.u32 %s169_s0, 4  ;;  %s77_s1 = int_to_ptr.vmem [resolvable:$true] %s76_s1 }
  0x1e   :  { %93 = vlog2.f32 %v41_v1  ;;  %v60_v14 = vsub.f32 1.0, %v42_v5  ;;  %v61_v17 = vsub.f32 1.0, %v43_v7  ;;  %s139_s21 = scalar_lea.vmem %s77_s1, 128  ;;  %p144_p11 = scmp.lt.s32.totalorder %s77_s1, %s77_s1 }
  0x1f   :  { %95 = vlog2.f32 %v50_v2  ;;  %p140_p10 = scmp.ne.s32.totalorder %s77_s1, %s139_s21  ;;  %p145_p12 = scmp.lt.s32.totalorder %s139_s21, %s139_s21 }
  0x20   :  { %97 = vlog2.f32 %v51_v3 }
  0x21   :  { %p146_p13 = por %p145_p12, %p144_p11 }
  0x23   :  { %p147_p0 = pnand %p146_p13, %p140_p10 }
  0x2a   :  { %v92_v4 = vpop.eup %91 }
  0x2b   :  { %v94_v6 = vpop.eup %93  ;;  %v45_v8 = vmul.f32 0.6931472, %v92_v4 }
  0x2c   :  { %v96_v9 = vpop.eup %95  ;;  %v47_v10 = vmul.f32 0.6931472, %v94_v6 }
  0x2d   :  { %v98_v11 = vpop.eup %97  ;;  %v48_v12 = vmax.f32 %v45_v8, -100.0  ;;  %v53_v13 = vmul.f32 0.6931472, %v96_v9 }
  0x2e   :  { %v49_v15 = vmax.f32 %v47_v10, -100.0  ;;  %v55_v16 = vmul.f32 0.6931472, %v98_v11 }
  0x2f   :  { %v56_v18 = vmax.f32 %v53_v13, -100.0  ;;  %v58_v19 = vmul.f32 %v48_v12, %v42_v5 }
  0x30   :  { %v57_v20 = vmax.f32 %v55_v16, -100.0  ;;  %v59_v21 = vmul.f32 %v49_v15, %v43_v7 }
  0x31   :  { %v62_v22 = vmul.f32 %v60_v14, %v56_v18 }
  0x32   :  { %v63_v23 = vmul.f32 %v61_v17, %v57_v20 }
  0x33   :  { %v64_v24 = vadd.f32 %v62_v22, %v58_v19 }
  0x34   :  { %v65_v25 = vadd.f32 %v63_v23, %v59_v21 }
  0x35   :  { %v66_v26 = vsub.f32 0.0, %v64_v24 }
  0x36   :  { %v67_v27 = vsub.f32 0.0, %v65_v25 }
  0x38   :  { %v68_v28 = vadd.f32 %v67_v27, %v66_v26 }
  0x3a   :  { %69 = vst [vmem:[#allocation7] sm:$0xff] %v68_v28 }
  0x3b   :  { %150 = shalt.err (!%p147_p0)
}
  0x3c   :  { %79 = dma.vmem_to_hbm [thread:$0]  %s77_s1, 128, %s196_s2, [#allocation4]  }
  0x3d   :  { %163 = dma.done.wait [#allocation4], 128  }
  0x3e   :  { %164 = vsyncadd [#allocation4], 4294967168 }
  0x3f   :  { %83 = vsyncpa [#allocation3], 1 }
  0x40   :  { %84 = vsyncpa [#allocation6], 1 }
  0x41   :  { %85 = vsyncpa [#allocation4], 1 }

</bundles_post_ra>
